<compile_context>
chip_gen: v7x
topology: tpu7x:2x2x1
jax: 0.10.0
libtpu: 0.0.40
codegen_flags: <defaults>
</compile_context>

<pallas_src>
import jax
import jax.numpy as jnp
from jax.experimental import pallas as pl
from jax.experimental.pallas import tpu as pltpu


def _ssa_kernel(w_ref, b_ref, x_ref, o_ref):
    """SimpleSpatialAttention for one batch element.

    w_ref: (C,)        SMEM  1x1-conv weights (one scalar per input channel)
    b_ref: (1,)        SMEM  1x1-conv bias
    x_ref: (1, C, HW)  VMEM  input (NCHW with H*W flattened onto lanes)
    o_ref: (1, C, HW)  VMEM  output
    """
    x = x_ref[0].astype(jnp.float32)                 # (C, HW), lane-dense
    C, HW = x.shape

    # 1x1 conv == per-pixel channel contraction: C broadcast MACs on the VPU.
    logits = jnp.full((1, HW), b_ref[0], dtype=jnp.float32)
    for c in range(C):                               # C tiny & static -> unroll
        logits = logits + w_ref[c] * x[c:c + 1, :]

    s = jax.nn.sigmoid(logits)                       # (1, HW), EUP
    o_ref[0] = (x * s).astype(o_ref.dtype)           # broadcast over channels


def simple_spatial_attention_pallas(x_nchw, w, b):
    """x_nchw: (N, C, H, W).  w: (C,) conv1x1 weight.  b: (1,) bias."""
    N, C, H, W = x_nchw.shape
    HW = H * W
    x_flat = x_nchw.reshape(N, C, HW)                # free reshape (row-major)

    x_spec = pl.BlockSpec((1, C, HW), lambda n, w_ref, b_ref: (n, 0, 0))

    out = pl.pallas_call(
        _ssa_kernel,
        out_shape=jax.ShapeDtypeStruct((N, C, HW), x_nchw.dtype),
        grid_spec=pltpu.PrefetchScalarGridSpec(
            num_scalar_prefetch=2,                   # w, b -> SMEM
            grid=(N,),
            in_specs=[x_spec],
            out_specs=x_spec,
        ),
        compiler_params=pltpu.CompilerParams(
            dimension_semantics=("parallel",)),
    )(w, b, x_flat)
    return out.reshape(N, C, H, W)


# ---------------- pure-JAX reference (mirrors the PyTorch module) -----------
def ssa_reference(x_nchw, w, b):
    # sa_conv: Conv2d(C, 1, kernel_size=1, stride=1) -> per-pixel dot over C
    logits = jnp.einsum("nchw,c->nhw", x_nchw, w) + b[0]
    return x_nchw * jax.nn.sigmoid(logits)[:, None, :, :]


if __name__ == "__main__":
    N, C, H, W = 2, 4, 16, 16
    key = jax.random.PRNGKey(0)
    k_w, k_b, k_x = jax.random.split(key, 3)

    # PyTorch weight layout is (1, C, 1, 1); the kernel consumes it as (C,).
    w = 0.1 * jax.random.normal(k_w, (C,), jnp.float32)
    b = 0.1 * jax.random.normal(k_b, (1,), jnp.float32)
    x = jax.random.normal(k_x, (N, C, H, W), jnp.float32)

    out = jax.block_until_ready(simple_spatial_attention_pallas(x, w, b))
    ref = jax.block_until_ready(ssa_reference(x, w, b))

    if not jnp.allclose(out, ref, rtol=1e-5, atol=1e-5):
        raise AssertionError("Pallas SimpleSpatialAttention mismatch vs JAX reference")

    print("KERNEL_OK")
</pallas_src>

<mosaic_0001>
module attributes {stable_mosaic.version = 11 : i64} {
  func.func @_ssa_kernel(%arg0: i32, %arg1: memref<4xf32, #tpu.memory_space<smem>>, %arg2: memref<1xf32, #tpu.memory_space<smem>>, %arg3: memref<1x4x256xf32, #tpu.memory_space<vmem>>, %arg4: memref<1x4x256xf32, #tpu.memory_space<vmem>>) attributes {dimension_semantics = [#tpu.dimension_semantics<parallel>], iteration_bounds = array<i64: 2>, scalar_prefetch = 2 : i64, scratch_operands = 0 : i64, tpu.core_type = #tpu.core_type<tc>, window_params = [{transform_indices = @transform_0, window_bounds = array<i64: 1, 4, 256>}, {transform_indices = @transform_1, window_bounds = array<i64: 1, 4, 256>}]} {
    %c0 = arith.constant 0 : index
    %c0_0 = arith.constant 0 : index
    %c0_1 = arith.constant 0 : index
    %0 = vector.load %arg3[%c0, %c0_0, %c0_1] : memref<1x4x256xf32, #tpu.memory_space<vmem>>, vector<1x4x256xf32>
    %1 = vector.shape_cast %0 : vector<1x4x256xf32> to vector<4x256xf32>
    %c0_2 = arith.constant 0 : index
    %2 = memref.load %arg2[%c0_2] : memref<1xf32, #tpu.memory_space<smem>>
    %3 = vector.broadcast %2 : f32 to vector<1x256xf32>
    %c0_3 = arith.constant 0 : index
    %4 = memref.load %arg1[%c0_3] : memref<4xf32, #tpu.memory_space<smem>>
    %5 = vector.extract_strided_slice %1 {offsets = [0, 0], sizes = [1, 256], strides = [1, 1]} : vector<4x256xf32> to vector<1x256xf32>
    %6 = vector.broadcast %4 : f32 to vector<1x256xf32>
    %7 = arith.mulf %6, %5 : vector<1x256xf32>
    %8 = arith.addf %3, %7 : vector<1x256xf32>
    %c1 = arith.constant 1 : index
    %9 = memref.load %arg1[%c1] : memref<4xf32, #tpu.memory_space<smem>>
    %10 = vector.extract_strided_slice %1 {offsets = [1, 0], sizes = [1, 256], strides = [1, 1]} : vector<4x256xf32> to vector<1x256xf32>
    %11 = vector.broadcast %9 : f32 to vector<1x256xf32>
    %12 = arith.mulf %11, %10 : vector<1x256xf32>
    %13 = arith.addf %8, %12 : vector<1x256xf32>
    %c2 = arith.constant 2 : index
    %14 = memref.load %arg1[%c2] : memref<4xf32, #tpu.memory_space<smem>>
    %15 = vector.extract_strided_slice %1 {offsets = [2, 0], sizes = [1, 256], strides = [1, 1]} : vector<4x256xf32> to vector<1x256xf32>
    %16 = vector.broadcast %14 : f32 to vector<1x256xf32>
    %17 = arith.mulf %16, %15 : vector<1x256xf32>
    %18 = arith.addf %13, %17 : vector<1x256xf32>
    %c3 = arith.constant 3 : index
    %19 = memref.load %arg1[%c3] : memref<4xf32, #tpu.memory_space<smem>>
    %20 = vector.extract_strided_slice %1 {offsets = [3, 0], sizes = [1, 256], strides = [1, 1]} : vector<4x256xf32> to vector<1x256xf32>
    %21 = vector.broadcast %19 : f32 to vector<1x256xf32>
    %22 = arith.mulf %21, %20 : vector<1x256xf32>
    %23 = arith.addf %18, %22 : vector<1x256xf32>
    %24 = arith.negf %23 : vector<1x256xf32>
    %25 = math.exp %24 : vector<1x256xf32>
    %cst = arith.constant 1.000000e+00 : f32
    %26 = vector.broadcast %cst : f32 to vector<1x256xf32>
    %27 = arith.addf %26, %25 : vector<1x256xf32>
    %28 = arith.divf %26, %27 : vector<1x256xf32>
    %29 = vector.broadcast %28 : vector<1x256xf32> to vector<4x256xf32>
    %30 = arith.mulf %1, %29 : vector<4x256xf32>
    %c0_4 = arith.constant 0 : index
    %c0_5 = arith.constant 0 : index
    %c0_6 = arith.constant 0 : index
    %31 = vector.load %arg4[%c0_4, %c0_5, %c0_6] : memref<1x4x256xf32, #tpu.memory_space<vmem>>, vector<1x4x256xf32>
    %32 = vector.shape_cast %31 : vector<1x4x256xf32> to vector<4x256xf32>
    %33 = vector.shape_cast %30 : vector<4x256xf32> to vector<1x4x256xf32>
    tpu.vector_store %arg4[%c0_4, %c0_5, %c0_6], %33 {strides = array<i32>} : memref<1x4x256xf32, #tpu.memory_space<vmem>>, vector<1x4x256xf32>,
    return
  }
  func.func @transform_0(%arg0: i32, %arg1: memref<4xf32, #tpu.memory_space<smem>>, %arg2: memref<1xf32, #tpu.memory_space<smem>>) -> (i32, i32, i32) {
    %c0_i32 = arith.constant 0 : i32
    %c0_i32_0 = arith.constant 0 : i32
    %c0_i32_1 = arith.constant 0 : i32
    return %arg0, %c0_i32, %c0_i32_0 : i32, i32, i32
  }
  func.func @transform_1(%arg0: i32, %arg1: memref<4xf32, #tpu.memory_space<smem>>, %arg2: memref<1xf32, #tpu.memory_space<smem>>) -> (i32, i32, i32) {
    %c0_i32 = arith.constant 0 : i32
    %c0_i32_0 = arith.constant 0 : i32
    %c0_i32_1 = arith.constant 0 : i32
    return %arg0, %c0_i32, %c0_i32_0 : i32, i32, i32
  }
}

</mosaic_0001>

<bundles_post_ra>
// kernel: tpu_custom_call.1
= control target key start
LH: loop header
LB: loop body
LE: loop exit
PB: predicated region body
PF: predicated region fallthrough
CT: control target
= control target key end

     0   :  { %s669_s0 = inlined_call_operand.vmem [shape: f32[4], index: 0, kind: input, shape index: {}]   ;;  %s670_s1 = inlined_call_operand.<no memory space> [shape: f32[1], index: 1, kind: input, shape index: {}]   ;;  %s671_s2 = inlined_call_operand.hbm [shape: f32[2,4,256], index: 2, kind: input, shape index: {}]   ;;  %s672_s3 = inlined_call_operand.hbm [shape: f32[2,4,256], index: 3, kind: output, shape index: {}]  }
   0x1   :  { %s8_s14 = sshll.u32 %s669_s0, 4  ;;  %12 = sst [smem:[#allocation4]] %s670_s1  ;;  %s9_s14 = int_to_ptr.vmem [resolvable:$true] %s8_s14 }
   0x2   :  { %s363_s17 = scalar_lea.vmem %s9_s14, 16  ;;  %p368_p1 = scmp.lt.s32.totalorder %s9_s14, %s9_s14 }
   0x3   :  { %p364_p0 = scmp.ne.s32.totalorder %s9_s14, %s363_s17  ;;  %p369_p2 = scmp.lt.s32.totalorder %s363_s17, %s363_s17 }
   0x5   :  { %p370_p3 = por %p369_p2, %p368_p1 }
   0x7   :  { %p371_p4 = pnand %p370_p3, %p364_p0 }
   0x9   :  { %374 = shalt.err (!%p371_p4)  }
   0xa   :  { %s475_s18 = smov [#allocation3]  }
   0xb   :  { %11 = dma.vmem_to_smem %s9_s14, 16, %s475_s18, [#allocation2] }
   0xc   :  { %449 = dma.done.wait [#allocation2], 16 }
   0xd   :  { %450 = vsyncadd [#allocation2], 4294967280 }
   0xe   :  { %14 = sfence }
   0xf   :  { %15 = vsyncpa [#allocation6], 0 }
  0x10   :  { %17 = vsyncpa [#allocation6 + $0x1], 0 }
  0x11   :  { %18 = vsyncpa [#allocation7], 0 }
  0x12   :  { %20 = vsyncpa [#allocation7 + $0x1], 0  ;;  %s504_s0 = smov 0   ;;  %s506_s1 = smov 0  }
  0x13   :  { %s508_s19 = smov 0   ;;  %s510_s20 = smov 0  }
  0x14 LB: > { %s525_s21 = sadd.s32 4294967295, %s473_s20   ;;  %s289_s22 = sadd.s32 4294967294, %s473_s20   ;;  %s473_s20 = sphi %s510_s20, %s687_s20   ;;  %s469_s19 = sphi %s508_s19, %s686_s19   ;;  %s465_s1 = sphi %s506_s1, %s685_s1   ;;  %s461_s0 = sphi %s504_s0, %s684_s0  }
  0x15   : > { %s529_s23 = sadd.s32 1, %s473_s20   ;;  %s33_s24 = sadd.s32 1, %s469_s19 }
  0x16   : > { %s30_s25 = ssub.s32 %s473_s20, %s529_s23  ;;  %p40_p5 = scmp.ne.s32.totalorder %s469_s19, %s465_s1 }
  0x17   : > { %p31_p6 = scmp.eq.s32.totalorder %s30_s25, 0  ;;  %p41_p7 = scmp.eq.s32.totalorder %s473_s20, 0 }
  0x18   : > { %p46_p8 = scmp.ne.s32.totalorder %s465_s1, %s461_s0  ;;  %p47_p9 = scmp.eq.s32.totalorder %s525_s21, 0 }
  0x19   : > { %s541_s26 = scalar_select %p31_p6, %s469_s19, %s33_s24  }
  0x1a   : > { %p543_p10 = por %p41_p7, %p40_p5  ;;  %p547_p11 = por %p47_p9, %p46_p8 }
  0x1b   : > { %p70_p12 = scmp.eq.s32.totalorder %s525_s21, 1  ;;  %p76_p13 = scmp.eq.s32.totalorder %s289_s22, 1 }
  0x1c   : > { %p324_p1 = scmp.lt.s32.totalorder %s473_s20, 2  ;;  %s96_s4 = sand.u32 1, %s469_s19  }
  0x1d   : > { %p554_p2 = por %p70_p12, %p40_p5  ;;  %p558_p3 = por %p76_p13, %p46_p8 }
  0x1e   : > { %s310_s5 = sshll.u32 %s473_s20, 7  ;;  %s292_s6 = sshll.u32 %s96_s4, 3 }
  0x1f   : > { %s676_s29 = scalar_select %p554_p2, 1, 0 }
  0x20   : > { %s677_s30 = scalar_select %p558_p3, 1, 0 }
  0x21   : > { %s567_s9 = scalar_lea.hbm %s671_s2, %s310_s5  ;;  %s100_s10 = scalar_lea.vmem [#allocation5], %s292_s6 }
  0x22   : > { %s108_s11 = sshll.u32 %s100_s10, 4  ;;  %p571_p4 = pnand %p324_p1, %p543_p10  ;;  %s575_s11 = int_to_ptr.vmem [resolvable:$true] %s108_s11 }
  0x23   : > { %s97_s13 = scalar_lea.sflag [#allocation6], %s96_s4  ;;  %s375_s14 = scalar_lea.hbm %s567_s9, 128 }
  0x24   : > { %p376_p7 = scmp.ne.s32.totalorder %s567_s9, %s375_s14  ;;  %p377_p8 = pneg %p571_p4 }
  0x25   : > { %s380_s17 = scalar_lea.hbm %s671_s2, 256  ;;  %p381_p10 = scmp.lt.u32.totalorder %s567_s9, %s671_s2 }
  0x26   : > { %p378_p9 = pnand %p377_p8, %p376_p7  ;;  %p382_p13 = scmp.lt.u32.totalorder %s380_s17, %s375_s14 }
  0x27   : > { %p384_p0 = scmp.lt.u32.totalorder %s375_s14, %s567_s9 }
  0x28   : > { %p379_p12 = pneg %p378_p9  ;;  %p383_p1 = por %p382_p13, %p381_p10 }
  0x2a   : > { %p385_p5 = por %p384_p0, %p383_p1 }
  0x2c   : > { %p386_p6 = pnand %p385_p5, %p379_p12 }
  0x2e   : > { %389 = shalt.err (!%p386_p6)
}
  0x2f   : > { %s390_s24 = scalar_lea.vmem %s575_s11, 128  ;;  %s476_s25 = smov [#allocation5]  }
  0x30   : > { %p391_p7 = scmp.ne.s32.totalorder %s575_s11, %s390_s24  ;;  %s395_s27 = sshll.u32 %s476_s25, 4  ;;  %s396_s27 = int_to_ptr.vmem [resolvable:$false] %s395_s27 }
  0x31   : > { %s397_s4 = scalar_lea.vmem %s396_s27, 256  ;;  %p398_p2 = scmp.lt.s32.totalorder %s575_s11, %s396_s27 }
  0x32   : > { %p393_p9 = pnand %p391_p7, %p377_p8  ;;  %p399_p10 = scmp.lt.s32.totalorder %s397_s4, %s390_s24 }
  0x34   : > { %p394_p3 = pneg %p393_p9  ;;  %p400_p13 = por %p399_p10, %p398_p2 }
  0x36   : > { %p401_p0 = pnand %p400_p13, %p394_p3 }
  0x38   : > { %404 = shalt.err (!%p401_p0)
}
  0x39   : > { %319 = dma.hbm_to_vmem [thread:$0]  (!%p571_p4), %s567_s9, 128, %s575_s11, %s97_s13  }
  0x3a   : > { %p679_p5 = scmp.lt.s32.totalorder %s473_s20, 3  ;;  %p680_p6 = scmp.ge.s32.totalorder %s473_s20, 1 }
  0x3c   : > { %p114_p8 = pnand %p680_p6, %p679_p5 }
  0x3d   : > { %s609_s5 = sand.u32 (!%p114_p8), 1, %s465_s1  }
  0x3e   : > { %117 = sbr.rel (%p114_p8) target bundleno = 136 (0x88), region = 24  ;;  %s296_s6 = sshll.u32 (!%p114_p8), %s609_s5, 3 }
  0x3f   : > { %s120_s7 = scalar_lea.sflag (!%p114_p8), [#allocation6], %s609_s5  ;;  %s123_s8 = scalar_lea.vmem (!%p114_p8), [#allocation5], %s296_s6 }
  0x45   : > { %452 = dma.done.wait (%p547_p11), %s120_s7, 128  }
  0x46   : > { %454 = vsyncadd (%p547_p11), %s120_s7, 4294967168  ;;  %s143_s9 = sld [smem:[#allocation4]]  ;;  %s298_s11 = sld [smem:[#allocation3 + $0x1]]  ;;  %v142_v2 = vld [vmem:[%s123_s8] sm:$0xff]  ;;  %v180_v20 = vlaneseq }
  0x47   : > { %s145_s10 = sld [smem:[#allocation3]]  ;;  %s300_s12 = sld [smem:[#allocation3 + $0x2]] }
  0x48   : > { %s302_s13 = sld [smem:[#allocation3 + $0x3]]  ;;  %v181_v21 = vshrl.u32 %v180_v20, 7  ;;  %s141_s28 = scalar_lea.vmem [#allocation8], %s296_s6 }
  0x49   : > { %s219_s14 = sshll.u32 %s141_s28, 4  ;;  %s311_s15 = sshll.u32 %s525_s21, 7  ;;  %s622_s14 = int_to_ptr.vmem [resolvable:$true] %s219_s14 }
  0x4a   : > { %v182_v22 = vsub.s32 0, %v181_v21  ;;  %v186_v23 = vsub.s32 4, %v181_v21  ;;  %s627_s18 = scalar_lea.hbm %s672_s3, %s311_s15  ;;  %s205_s22 = scalar_lea.sflag [#allocation7], %s609_s5 }
  0x4b   : > { %s405_s24 = scalar_lea.vmem %s622_s14, 128  ;;  %p681_p2 = scmp.ne.s32.totalorder %s676_s29, 0 }
  0x4c   : > { %v144_v0 = vstv %s143_s9  ;;  %v150_v3 = vstv %s298_s11  ;;  %p406_p11 = scmp.ne.s32.totalorder %s622_s14, %s405_s24  ;;  %s477_s21 = smov [#allocation8]  }
  0x4d   : > { %v146_v1 = vstv %s145_s10  ;;  %v158_v4 = vstv %s300_s12  ;;  %v151_v7 = vmul.f32 %v150_v3, %v142_v2  ;;  %s409_s25 = sshll.u32 %s477_s21, 4  ;;  %s410_s25 = int_to_ptr.vmem [resolvable:$false] %s409_s25 }
  0x4e   : > { %v147_v5 = vmul.f32 %v146_v1, %v142_v2  ;;  %v166_v6 = vstv %s302_s13  ;;  %v159_v8 = vmul.f32 %v158_v4, %v142_v2  ;;  %p407_p3 = pnand %p406_p11, %p681_p2  ;;  %s411_s27 = scalar_lea.vmem %s410_s25, 256 }
  0x4f   : > { %v167_v10 = vmul.f32 %v166_v6, %v142_v2  ;;  %v299_v11 = vrot.slane %v151_v7, 9  ;;  %p412_p12 = scmp.lt.s32.totalorder %s622_s14, %s410_s25  ;;  %p413_p1 = scmp.lt.s32.totalorder %s411_s27, %s405_s24 }
  0x50   : > { %v148_v9 = vadd.f32 %v147_v5, %v144_v0  ;;  %v301_v12 = vrot.slane %v159_v8, 10  ;;  %p408_p4 = pneg %p407_p3 }
  0x51   : > { %v303_v14 = vrot.slane %v167_v10, 11  ;;  %p414_p7 = por %p413_p1, %p412_p12 }
  0x52   : > { %v156_v13 = vadd.f32 %v299_v11, %v148_v9 }
  0x53   : > { %p415_p9 = pnand %p414_p7, %p408_p4 }
  0x54   : > { %v164_v15 = vadd.f32 %v301_v12, %v156_v13 }
  0x56   : > { %v172_v16 = vadd.f32 %v303_v14, %v164_v15 }
  0x58   : > { %v304_v17 = vmul.f32 -1.442695, %v172_v16 }
  0x5a   : > { %359 = vpow2.f32 %v304_v17 }
  0x64   : > { %v360_v18 = vpop.eup %359 }
  0x65   : > { %v176_v19 = vadd.f32 1.0, %v360_v18 }
  0x67   : > { %361 = vrcp.f32 %v176_v19 }
  0x71   : > { %v362_v24 = vpop.eup %361 }
  0x72   : > { %v183_v25 = vrot.slane %v362_v24, %v182_v22  ;;  %v187_v26 = vrot.slane %v362_v24, %v186_v23 }
  0x74   : > { %v193_v27 = vrot.slane %v183_v25, %v182_v22  ;;  %v197_v28 = vrot.slane %v187_v26, %v182_v22 }
  0x76   : > { %v200_v29 = vcombine.low %v193_v27, %v197_v28 }
  0x78   : > { %v202_v30 = vmul.f32 %v200_v29, %v142_v2 }
  0x7a   : > { %203 = vst [vmem:[%s141_s28] sm:$0xff] %v202_v30 }
  0x7b   : > { %418 = shalt.err (!%p415_p9)
}
  0x7c   : > { %s419_s4 = scalar_lea.hbm %s627_s18, 128  ;;  %s423_s7 = scalar_lea.hbm %s672_s3, 256 }
  0x7d   : > { %p420_p10 = scmp.ne.s32.totalorder %s627_s18, %s419_s4  ;;  %p424_p5 = scmp.lt.u32.totalorder %s627_s18, %s672_s3 }
  0x7e   : > { %p425_p6 = scmp.lt.u32.totalorder %s423_s7, %s419_s4  ;;  %p427_p11 = scmp.lt.u32.totalorder %s419_s4, %s627_s18 }
  0x7f   : > { %p421_p13 = pnand %p420_p10, %p681_p2 }
  0x80   : > { %p426_p8 = por %p425_p6, %p424_p5 }
  0x81   : > { %p422_p0 = pneg %p421_p13 }
  0x82   : > { %p428_p3 = por %p427_p11, %p426_p8 }
  0x84   : > { %p429_p4 = pnand %p428_p3, %p422_p0 }
  0x86   : > { %432 = shalt.err (!%p429_p4)
}
  0x87   : > { %314 = dma.vmem_to_hbm [thread:$0]  (%p681_p2), %s622_s14, 128, %s627_s18, %s205_s22  }
  0x88 PF: > { %s231_s10 = sand.u32 1, %s461_s0   ;;  %p682_p12 = scmp.ne.s32.totalorder %s677_s30, 0 }
  0x89   : > { %p683_p1 = scmp.ge.s32.totalorder %s473_s20, 2  ;;  %s232_s11 = scalar_lea.sflag [#allocation7], %s231_s10 }
  0x8b   : > { %p321_p7 = pnand %p683_p1, %p682_p12 }
  0x8d   : > { %456 = dma.done.wait (!%p321_p7), %s232_s11, 128  }
  0x8e   : > { %458 = vsyncadd (!%p321_p7), %s232_s11, 4294967168  ;;  %p23_p9 = scmp.ge.s32.totalorder %s529_s23, 4   ;;  %s684_s0 = smov %s465_s1 }
  0x8f   : > { %s685_s1 = smov %s469_s19  ;;  %s686_s19 = smov %s541_s26 }
  0x90   : > { %s687_s20 = smov %s529_s23  ;;  %25 = sbr.rel (!%p23_p9) target bundleno = 20 (0x14), region = 69 }
  0x97   :  { %237 = vsyncpa [#allocation6], 1 }
  0x98   :  { %239 = vsyncpa [#allocation6 + $0x1], 1 }
  0x99   :  { %240 = vsyncpa [#allocation7], 1 }
  0x9a   :  { %242 = vsyncpa [#allocation7 + $0x1], 1 }

</bundles_post_ra>
